<compile_context>
chip_gen: v5e
topology: v5e:2x2
jax: 0.10.0
libtpu: 0.0.40
codegen_flags: <defaults>
</compile_context>

<pallas_src>
import jax
import jax.numpy as jnp
from jax.experimental import pallas as pl
from jax.experimental.pallas import tpu as pltpu


_LANE = 128      # lane width (last-dim granularity)
_SUBLANE = 8     # sublane granularity (second-to-last dim)
_TM_MAX = 2048   # row-tile cap (per review: raise past 512 on 128 MiB chips)


def _cdiv(a, b):
    return -(-a // b)


def _round_up(n, m):
    return _cdiv(n, m) * m


def _vmem_capacity_bytes():
    """Per-core VMEM capacity; conservative 64 MiB fallback (v7x per-TC)."""
    try:
        cap = int(pltpu.get_tpu_info().vmem_capacity_bytes)
        if cap > 0:
            return cap
    except Exception:
        pass
    return 64 << 20


def _pw_kernel(x_ref, w_ref, lb_ref, o_ref):
    # x_ref : (TM, d_in)          one row tile (original dtype)
    # w_ref : (d_in, d_out_pad)   VMEM-resident (constant index_map), bf16
    # lb_ref: (1, d_out_pad)      folded effective bias, f32
    # o_ref : (TM, d_out_pad)
    x = x_ref[...].astype(w_ref.dtype)          # VPU cast -> full-rate bf16 MXU
    acc = jnp.dot(x, w_ref[...], preferred_element_type=jnp.float32)
    o_ref[...] = (acc + lb_ref[...]).astype(o_ref.dtype)


def prepare_pw_params(bias, weight, lin_bias, dtype=jnp.bfloat16):
    """One-time parameter prep.  Call OUTSIDE the hot path.

    bias:     (d_in,)        PWLayer centering bias
    weight:   (d_out, d_in)  nn.Linear weight (PyTorch layout)
    lin_bias: (d_out,)       nn.Linear bias

    Returns (w_packed, lb_packed, d_out):
      w_packed : (d_in, d_out_pad)  transposed, d_out zero-padded to lane
                 multiple only when ragged, cast to `dtype` (bf16 default).
      lb_packed: (1, d_out_pad) f32 folded effective bias (lb - b @ W^T).
    """
    d_out, d_in = weight.shape
    d_out_pad = _round_up(d_out, _LANE)

    w_f32 = weight.astype(jnp.float32)
    # Fold centering bias (exact, f32): (x-b)@W^T + lb == x@W^T + (lb - b@W^T)
    lb_eff = lin_bias.astype(jnp.float32) - bias.astype(jnp.float32) @ w_f32.T
    w_t = weight.T.astype(dtype)                                  # (d_in, d_out)

    if d_out_pad != d_out:
        w_packed = jnp.zeros((d_in, d_out_pad), dtype).at[:, :d_out].set(w_t)
        lb_packed = jnp.zeros((1, d_out_pad), jnp.float32).at[:, :d_out].set(lb_eff)
    else:
        w_packed = w_t
        lb_packed = lb_eff.reshape(1, d_out)
    return w_packed, lb_packed, d_out


def _choose_tm(m, d_in, d_out_pad, x_item, w_item):
    """Pick row-tile size from VMEM capacity; keep >=2 (even) grid steps."""
    vmem_cap = _vmem_capacity_bytes()
    budget = int(0.6 * vmem_cap)
    # Constant-index_map weight/bias still double-buffered by default -> 2x.
    resident = 2 * (d_in * d_out_pad * w_item) + 2 * (d_out_pad * 4)
    # Double-buffered x/out tiles + f32 accumulator intermediate per row.
    per_row = 2 * d_in * x_item + 2 * d_out_pad * x_item + d_out_pad * 4

    tm_cap = (budget - resident) // per_row
    tm_cap = max(_SUBLANE, min(_TM_MAX, (tm_cap // _SUBLANE) * _SUBLANE))

    n_tiles = _cdiv(m, tm_cap)
    if m >= 2 * _SUBLANE:
        n_tiles = max(n_tiles, 2)        # keep both v7x TensorCores busy
    if n_tiles > 1 and n_tiles % 2:
        n_tiles += 1                     # even split across 2 TCs
    tm = min(_round_up(_cdiv(m, n_tiles), _SUBLANE), tm_cap)

    vmem_est = resident + tm * per_row
    vmem_limit = int(min(max(2 * vmem_est, 32 << 20), int(0.9 * vmem_cap)))
    return tm, vmem_limit


def pw_layer_apply(x, w_packed, lb_packed, d_out):
    """x: (..., d_in) -> (..., d_out) using pre-packed parameters."""
    *lead, d_in = x.shape
    d_in_w, d_out_pad = w_packed.shape
    assert d_in == d_in_w, "d_in mismatch between x and packed weight"

    m = 1
    for s in lead:
        m *= s
    x2 = x.reshape(m, d_in)              # no padding, no extra HBM copy

    x_item = jnp.dtype(x2.dtype).itemsize
    w_item = jnp.dtype(w_packed.dtype).itemsize

    tm, vmem_limit = _choose_tm(m, d_in, d_out_pad, x_item, w_item)
    grid_m = _cdiv(m, tm)                # ragged last block is masked by Pallas

    cost = pl.CostEstimate(
        flops=2 * m * d_in * d_out_pad,
        bytes_accessed=(m * d_in * x_item
                        + d_in * d_out_pad * w_item
                        + d_out_pad * 4
                        + m * d_out_pad * x_item),
        transcendentals=0,
    )

    out2 = pl.pallas_call(
        _pw_kernel,
        out_shape=jax.ShapeDtypeStruct((m, d_out_pad), x.dtype),
        grid_spec=pltpu.PrefetchScalarGridSpec(
            num_scalar_prefetch=0,
            grid=(grid_m,),
            in_specs=[
                pl.BlockSpec((tm, d_in), lambda i: (i, 0)),
                pl.BlockSpec((d_in, d_out_pad), lambda i: (0, 0)),
                pl.BlockSpec((1, d_out_pad), lambda i: (0, 0)),
            ],
            out_specs=pl.BlockSpec((tm, d_out_pad), lambda i: (i, 0)),
        ),
        compiler_params=pltpu.CompilerParams(
            dimension_semantics=("parallel",),   # rows independent; 2-TC shard
            vmem_limit_bytes=vmem_limit,
        ),
        cost_estimate=cost,
    )(x2, w_packed, lb_packed)

    if d_out_pad != d_out:
        out2 = out2[:, :d_out]           # only for ragged d_out (e.g. 300)
    return out2.reshape(*lead, d_out)


def pw_layer(x, bias, weight, lin_bias):
    """Convenience wrapper matching the module API.

    NOTE: in real use, call prepare_pw_params() once and reuse the packed
    params across calls (avoids per-call transpose / bias fold / repack).
    """
    w_packed, lb_packed, d_out = prepare_pw_params(bias, weight, lin_bias)
    return pw_layer_apply(x, w_packed, lb_packed, d_out)


def pw_layer_ref(x, bias, weight, lin_bias):
    return jnp.einsum("...i,oi->...o", x - bias, weight) + lin_bias


def _make_case(key, shape, d_out):
    d_in = shape[-1]
    kx, kw, kb, kpb = jax.random.split(key, 4)
    x = jax.random.normal(kx, shape, dtype=jnp.float32)
    bound = 1.0 / jnp.sqrt(jnp.float32(d_in))
    # PyTorch initializes self.bias to zeros; use a non-zero bias so the
    # bias-folding path is actually exercised.
    pw_bias = 0.1 * jax.random.normal(kpb, (d_in,), dtype=jnp.float32)
    lin_w = jax.random.uniform(kw, (d_out, d_in), minval=-bound, maxval=bound,
                               dtype=jnp.float32)
    lin_b = jax.random.uniform(kb, (d_out,), minval=-bound, maxval=bound,
                               dtype=jnp.float32)
    return x, pw_bias, lin_w, lin_b


if __name__ == "__main__":
    # bf16 MXU operands vs f32 reference -> loosened tolerance (per review).
    ATOL, RTOL = 5e-2, 5e-2

    # Case 1: small shapes consistent with the module test harness.
    x1, b1, w1, lb1 = _make_case(jax.random.PRNGKey(0), (2, 8, 32), 32)
    out1 = jax.block_until_ready(pw_layer(x1, b1, w1, lb1))
    ref1 = pw_layer_ref(x1, b1, w1, lb1)
    assert out1.shape == (2, 8, 32)
    assert jnp.allclose(out1, ref1, atol=ATOL, rtol=RTOL), "mismatch (case 1)"

    # Case 2: UniSRec-like ragged shapes (non-128 d_out, ragged rows).
    x2, b2, w2, lb2 = _make_case(jax.random.PRNGKey(1), (3, 17, 48), 300)
    out2 = jax.block_until_ready(pw_layer(x2, b2, w2, lb2))
    ref2 = pw_layer_ref(x2, b2, w2, lb2)
    assert out2.shape == (3, 17, 300)
    assert jnp.allclose(out2, ref2, atol=ATOL, rtol=RTOL), "mismatch (case 2)"

    # Case 3: lane-aligned d_out (no pad / no slice) with a multi-tile grid.
    x3, b3, w3, lb3 = _make_case(jax.random.PRNGKey(2), (4, 64, 96), 256)
    out3 = jax.block_until_ready(pw_layer(x3, b3, w3, lb3))
    ref3 = pw_layer_ref(x3, b3, w3, lb3)
    assert out3.shape == (4, 64, 256)
    assert jnp.allclose(out3, ref3, atol=ATOL, rtol=RTOL), "mismatch (case 3)"

    print("KERNEL_OK")
</pallas_src>

<mosaic_0001>
module attributes {stable_mosaic.version = 11 : i64} {
  func.func @_pw_kernel(%arg0: i32, %arg1: memref<8x32xf32, #tpu.memory_space<vmem>>, %arg2: memref<32x128xbf16, #tpu.memory_space<vmem>>, %arg3: memref<1x128xf32, #tpu.memory_space<vmem>>, %arg4: memref<8x128xf32, #tpu.memory_space<vmem>>) attributes {dimension_semantics = [#tpu.dimension_semantics<parallel>], iteration_bounds = array<i64: 2>, scalar_prefetch = 0 : i64, scratch_operands = 0 : i64, tpu.core_type = #tpu.core_type<tc>, window_params = [{transform_indices = @transform_0, window_bounds = array<i64: 8, 32>}, {pipeline_mode = #tpu.pipeline_mode<synchronous>, transform_indices = @transform_1, window_bounds = array<i64: 32, 128>}, {pipeline_mode = #tpu.pipeline_mode<synchronous>, transform_indices = @transform_2, window_bounds = array<i64: 1, 128>}, {transform_indices = @transform_3, window_bounds = array<i64: 8, 128>}]} {
    %c0 = arith.constant 0 : index
    %c0_0 = arith.constant 0 : index
    %0 = vector.load %arg1[%c0, %c0_0] : memref<8x32xf32, #tpu.memory_space<vmem>>, vector<8x32xf32>
    %1 = arith.truncf %0 : vector<8x32xf32> to vector<8x32xbf16>
    %c0_1 = arith.constant 0 : index
    %c0_2 = arith.constant 0 : index
    %2 = vector.load %arg2[%c0_1, %c0_2] : memref<32x128xbf16, #tpu.memory_space<vmem>>, vector<32x128xbf16>
    %cst = arith.constant dense<0.000000e+00> : vector<8x128xf32>
    %3 = tpu.matmul %1, %2, %cst {dimension_numbers = #tpu.dot_dimension_numbers<[1], [0], [0], [1], [0, 0, 1, 1], [], []>} : vector<8x32xbf16>, vector<32x128xbf16>, vector<8x128xf32> -> vector<8x128xf32>
    %c0_3 = arith.constant 0 : index
    %c0_4 = arith.constant 0 : index
    %4 = vector.load %arg3[%c0_3, %c0_4] : memref<1x128xf32, #tpu.memory_space<vmem>>, vector<1x128xf32>
    %5 = vector.broadcast %4 : vector<1x128xf32> to vector<8x128xf32>
    %6 = arith.addf %3, %5 : vector<8x128xf32>
    %c0_5 = arith.constant 0 : index
    %c0_6 = arith.constant 0 : index
    %7 = vector.load %arg4[%c0_5, %c0_6] : memref<8x128xf32, #tpu.memory_space<vmem>>, vector<8x128xf32>
    tpu.vector_store %arg4[%c0_5, %c0_6], %6 {strides = array<i32>} : memref<8x128xf32, #tpu.memory_space<vmem>>, vector<8x128xf32>,
    return
  }
  func.func @transform_0(%arg0: i32) -> (i32, i32) {
    %c0_i32 = arith.constant 0 : i32
    %c0_i32_0 = arith.constant 0 : i32
    return %arg0, %c0_i32 : i32, i32
  }
  func.func @transform_1(%arg0: i32) -> (i32, i32) {
    %c0_i32 = arith.constant 0 : i32
    %c0_i32_0 = arith.constant 0 : i32
    %c0_i32_1 = arith.constant 0 : i32
    return %c0_i32, %c0_i32_0 : i32, i32
  }
  func.func @transform_2(%arg0: i32) -> (i32, i32) {
    %c0_i32 = arith.constant 0 : i32
    %c0_i32_0 = arith.constant 0 : i32
    %c0_i32_1 = arith.constant 0 : i32
    return %c0_i32, %c0_i32_0 : i32, i32
  }
  func.func @transform_3(%arg0: i32) -> (i32, i32) {
    %c0_i32 = arith.constant 0 : i32
    %c0_i32_0 = arith.constant 0 : i32
    return %arg0, %c0_i32 : i32, i32
  }
}

</mosaic_0001>

<bundles_post_ra>
// kernel: tpu_custom_call.1
= control target key start
LH: loop header
LB: loop body
LE: loop exit
PB: predicated region body
PF: predicated region fallthrough
CT: control target
= control target key end

     0   :  { %8 = vsyncpa [#allocation3], 0  ;;  %s721_s0 = inlined_call_operand.hbm [shape: f32[16,32], index: 0, kind: input, shape index: {}]   ;;  %s722_s1 = inlined_call_operand.hbm [shape: bf16[32,128], index: 1, kind: input, shape index: {}]   ;;  %s723_s2 = inlined_call_operand.vmem [shape: f32[1,128], index: 2, kind: input, shape index: {}]   ;;  %s724_s3 = inlined_call_operand.hbm [shape: f32[16,128], index: 3, kind: output, shape index: {}]  }
   0x1   :  { %10 = vsyncpa [#allocation3 + $0x1], 0 }
   0x2   :  { %11 = vsyncpa [#allocation6], 0 }
   0x3   :  { %12 = vsyncpa [#allocation4], 0 }
   0x4   :  { %14 = vsyncpa [#allocation4 + $0x1], 0  ;;  %s582_s12 = smov 0   ;;  %s584_s13 = smov 0  }
   0x5   :  { %s586_s14 = smov 0   ;;  %s588_s15 = smov 0  }
   0x6 LB: > { %s130_s18 = sshll.u32 %s722_s1, 4  ;;  %s606_s19 = sadd.s32 4294967295, %s557_s15   ;;  %s557_s15 = sphi %s588_s15, %s734_s15   ;;  %s553_s14 = sphi %s586_s14, %s733_s14   ;;  %s549_s13 = sphi %s584_s13, %s732_s13   ;;  %s545_s12 = sphi %s582_s12, %s731_s12   ;;  %s131_s18 = int_to_ptr.hbm [resolvable:$true] %s130_s18 }
   0x7   : > { %p343_p0 = scmp.ge.s32.totalorder %s557_s15, 1  ;;  %p41_p1 = scmp.eq.s32.totalorder %s606_s19, 0 }
   0x8   : > { %p119_p2 = scmp.lt.s32.totalorder %s557_s15, 3  ;;  %s559_s21 = smov [#allocation5]  }
   0x9   : > { %s132_s22 = sshll.u32 %s559_s21, 4  ;;  %s560_s23 = smov 64   ;;  %s133_s22 = int_to_ptr.vmem [resolvable:$true] %s132_s22 }
   0xa   : > { %p611_p3 = pnand %p343_p0, %p119_p2  ;;  %s561_s24 = smov 4  }
   0xb   : > { %s342_s25 = sadd.s32 4294967294, %s557_s15   ;;  %s622_s26 = sadd.s32 1, %s557_s15  }
   0xc   : > { %p375_p4 = pneg %p611_p3  ;;  %s27_s27 = sadd.s32 1, %s553_s14 }
   0xd   : > { %s24_s28 = ssub.s32 %s557_s15, %s622_s26  ;;  %p34_p7 = scmp.ne.s32.totalorder %s553_s14, %s549_s13 }
   0xe   : > { %p376_p6 = pnand %p375_p4, %p41_p1  ;;  %p25_p8 = scmp.eq.s32.totalorder %s24_s28, 0 }
   0xf   : > { %p35_p9 = scmp.eq.s32.totalorder %s557_s15, 0  ;;  %p40_p10 = scmp.ne.s32.totalorder %s549_s13, %s545_s12 }
  0x10   : > { %378 = dma.hbm_to_vmem [thread:$0]  (!%p376_p6), %s131_s18, 256, %s133_s22, [#allocation6], %s560_s23, %s560_s23, %s561_s24  }
  0x11   : > { %p106_p11 = scmp.eq.s32.totalorder %s606_s19, 1  ;;  %p638_p12 = por %p41_p1, %p40_p10 }
  0x12   : > { %s634_s29 = scalar_select %p25_p8, %s553_s14, %s27_s27  }
  0x13   : > { %p642_p13 = por %p106_p11, %p34_p7  ;;  %p112_p0 = scmp.eq.s32.totalorder %s342_s25, 1 }
  0x14   : > { %p36_p2 = por %p35_p9, %p34_p7  ;;  %s149_s5 = sand.u32 1, %s553_s14  }
  0x15   : > { %p647_p4 = por %p112_p0, %p40_p10  ;;  %p388_p6 = scmp.lt.s32.totalorder %s557_s15, 2 }
  0x16   : > { %s346_s7 = sshll.u32 %s149_s5, 3  ;;  %s347_s8 = sshll.u32 %s557_s15, 3 }
  0x17   : > { %s157_s11 = scalar_lea.hbm %s721_s0, %s347_s8  ;;  %s153_s17 = scalar_lea.vmem [#allocation2], %s346_s7 }
  0x18   : > { %s159_s16 = sshll.u32 %s157_s11, 4  ;;  %s161_s18 = sshll.u32 %s153_s17, 4  ;;  %s160_s16 = int_to_ptr.hbm [resolvable:$true] %s159_s16  ;;  %s162_s18 = int_to_ptr.vmem [resolvable:$true] %s161_s18 }
  0x19   : > { %p656_p8 = pnand %p388_p6, %p36_p2  ;;  %s150_s22 = scalar_lea.sflag [#allocation3], %s149_s5 }
  0x1a   : > { %s457_s23 = sshra.s32 %s160_s16, 4  ;;  %s464_s28 = scalar_lea.hbm %s721_s0, 16  ;;  %s458_s23 = int_to_ptr.hbm [resolvable:$true] %s457_s23 }
  0x1b   : > { %s459_s24 = scalar_lea.hbm %s458_s23, 8  ;;  %p461_p9 = pneg %p656_p8 }
  0x1c   : > { %p460_p7 = scmp.ne.s32.totalorder %s458_s23, %s459_s24  ;;  %p465_p0 = scmp.lt.s32.totalorder %s458_s23, %s721_s0 }
  0x1d   : > { %p466_p2 = scmp.lt.s32.totalorder %s464_s28, %s459_s24 }
  0x1e   : > { %p462_p10 = pnand %p461_p9, %p460_p7 }
  0x1f   : > { %p467_p6 = por %p466_p2, %p465_p0 }
  0x20   : > { %p463_p11 = pneg %p462_p10 }
  0x22   : > { %p468_p5 = pnand %p467_p6, %p463_p11 }
  0x24   : > { %471 = shalt.err (!%p468_p5)
}
  0x25   : > { %382 = dma.hbm_to_vmem [thread:$0]  (!%p656_p8), %s160_s16, 128, %s162_s18, %s150_s22  }
  0x26   : > { %170 = sbr.rel (%p611_p3) target bundleno = 188 (0xbc), region = 32  ;;  %s673_s5 = sand.u32 (!%p611_p3), 1, %s549_s13  }
  0x27   : > { %s349_s9 = sshll.u32 (!%p611_p3), %s673_s5, 3  ;;  %s173_s10 = scalar_lea.sflag (!%p611_p3), [#allocation3], %s673_s5 }
  0x28   : > { %s176_s11 = scalar_lea.vmem (!%p611_p3), [#allocation2], %s349_s9 }
  0x2b   : > { %532 = dma.done.wait (%p638_p12), %s173_s10, 128  }
  0x2c   : > { %534 = vsyncadd (%p638_p12), %s173_s10, 4294967168 }
  0x2d   : > { %536 = dma.done.wait (%p41_p1), [#allocation6], 256  }
  0x2e   : > { %538 = vsyncadd (%p41_p1), [#allocation6], 4294967040  ;;  %v366_v0 = vld [vmem:[#allocation5 + $0x8] sm:$0xff]  ;;  %v365_v1 = vld [vmem:[#allocation5] sm:$0xff]  ;;  %vm228_vm0 = vcmask 261120   ;;  %s362_s20 = sshll.u32 %s606_s19, 3 }
  0x2f   : > { %238 = vmatpush.bf16.msra.mxu0 %v366_v0  ;;  %v206_v2 = vld [vmem:[%s176_s11] sm:$0xff]  ;;  %s257_s17 = scalar_lea.hbm %s724_s3, %s362_s20  ;;  %s204_s22 = scalar_lea.vmem [#allocation7], %s349_s9 }
  0x30   : > { %v207_v3 = vpack.c.bf16 %v206_v2, %v206_v2  ;;  %v426_v4 = vld [vmem:[%s723_s2] ss:$0 sm:$0xff]  ;;  %s259_s23 = sshll.u32 %s204_s22, 4  ;;  %s261_s24 = sshll.u32 %s257_s17, 4  ;;  %s260_s23 = int_to_ptr.vmem [resolvable:$true] %s259_s23  ;;  %s262_s24 = int_to_ptr.hbm [resolvable:$true] %s261_s24 }
  0x31   : > { %s247_s25 = scalar_lea.sflag [#allocation4], %s673_s5  ;;  %s501_s27 = sshra.s32 %s262_s24, 4  ;;  %s502_s27 = int_to_ptr.hbm [resolvable:$true] %s501_s27 }
  0x32   : > { %s503_s19 = scalar_lea.hbm %s502_s27, 8  ;;  %s507_s8 = scalar_lea.hbm %s724_s3, 16 }
  0x33   : > { %239 = vmatpush.bf16.msra.mxu0 %v365_v1  ;;  %p504_p1 = scmp.ne.s32.totalorder %s502_s27, %s503_s19  ;;  %p508_p12 = scmp.lt.s32.totalorder %s502_s27, %s724_s3 }
  0x34   : > { %p509_p8 = scmp.lt.s32.totalorder %s507_s8, %s503_s19 }
  0x35   : > { %p505_p3 = pnand %p504_p1, %p642_p13 }
  0x36   : > { %360 = vmatmul.msk.bf16.vlgmr.msra.gmra.mxu0 %vm228_vm0, %v207_v3  ;;  %p510_p7 = por %p509_p8, %p508_p12 }
  0x37   : > { %p506_p5 = pneg %p505_p3 }
  0x39   : > { %p511_p9 = pnand %p510_p7, %p506_p5 }
  0xb3   : > { %v241_v5 = vpop.f32.mrf.mxu0 }
  0xb4   : > { %v242_v6 = vadd.f32 %v426_v4, %v241_v5 }
  0xb6   : > { %245 = vst [vmem:[%s204_s22] sm:$0xff] %v242_v6 }
  0xb7   : > { %514 = shalt.err (!%p511_p9)
}
  0xb8   : > { %373 = dma.vmem_to_hbm [thread:$0]  (%p642_p13), %s260_s23, 128, %s262_s24, %s247_s25  }
  0xbb   : > { %v243_v7 = vpop.f32.mrf.mxu0 }
  0xbc PF: > { %s273_s5 = sand.u32 1, %s545_s12   ;;  %p730_p10 = scmp.ge.s32.totalorder %s557_s15, 2 }
  0xbd   : > { %s274_s11 = scalar_lea.sflag [#allocation4], %s273_s5 }
  0xbe   : > { %p384_p11 = pnand %p730_p10, %p647_p4 }
  0xc0   : > { %p385_p0 = pneg %p384_p11 }
  0xc2   : > { %540 = dma.done.wait (%p385_p0), %s274_s11, 128  }
  0xc3   : > { %542 = vsyncadd (%p385_p0), %s274_s11, 4294967168  ;;  %p17_p2 = scmp.ge.s32.totalorder %s622_s26, 4   ;;  %s731_s12 = smov %s549_s13 }
  0xc4   : > { %s732_s13 = smov %s553_s14  ;;  %s733_s14 = smov %s634_s29 }
  0xc5   : > { %s734_s15 = smov %s622_s26  ;;  %19 = sbr.rel (!%p17_p2) target bundleno = 6 (0x6), region = 81 }
  0xca   :  { %280 = vsyncpa [#allocation3], 1 }
  0xcb   :  { %282 = vsyncpa [#allocation3 + $0x1], 1 }
  0xcc   :  { %283 = vsyncpa [#allocation6], 1 }
  0xcd   :  { %284 = vsyncpa [#allocation4], 1 }
  0xce   :  { %286 = vsyncpa [#allocation4 + $0x1], 1 }

</bundles_post_ra>
